<compile_context>
chip_gen: v6e
topology: v6e:2x2x1
jax: 0.10.0
libtpu: 0.0.40
codegen_flags: <defaults>
</compile_context>

<pallas_src>
import jax
import jax.numpy as jnp
from jax.experimental import pallas as pl
from jax.experimental.pallas import tpu as pltpu


def _round_up(a: int, m: int) -> int:
    return ((a + m - 1) // m) * m


def mlp_kernel(x_ref, w1_ref, b1_ref, w2_ref, b2_ref, w3_ref, b3_ref, o_ref):
    # x: (TILE_B, 17).  Weights are already (in, out) — no in-kernel transpose.
    x = x_ref[...]

    # Linear(17 -> 10) + ReLU
    h1 = jnp.dot(x, w1_ref[...], preferred_element_type=jnp.float32) + b1_ref[...]
    h1 = jnp.maximum(h1, 0.0)

    # Linear(10 -> 5) + ReLU
    h2 = jnp.dot(h1, w2_ref[...], preferred_element_type=jnp.float32) + b2_ref[...]
    h2 = jnp.maximum(h2, 0.0)

    # Linear(5 -> 1)
    out = jnp.dot(h2, w3_ref[...], preferred_element_type=jnp.float32) + b3_ref[...]
    o_ref[...] = out.astype(o_ref.dtype)


def network_forward(x, params, tile_b: int = 512):
    """x: (B, 17) float32.  params: dict of w1,b1,w2,b2,w3,b3 (PyTorch shapes)."""
    # Pre-transpose weights once in the wrapper: (out, in) -> (in, out).
    w1 = params["w1"].T                      # (17, 10)
    w2 = params["w2"].T                      # (10, 5)
    w3 = params["w3"].T                      # (5, 1)
    b1 = params["b1"].reshape(1, -1)         # (1, 10)
    b2 = params["b2"].reshape(1, -1)         # (1, 5)
    b3 = params["b3"].reshape(1, -1)         # (1, 1)

    B, F = x.shape
    # Tile the batch: multiple of 8 (f32 sublanes), capped at `tile_b` rows.
    tb = min(tile_b, _round_up(B, 8))
    Bp = _round_up(B, tb)
    if Bp != B:
        x_in = jnp.zeros((Bp, F), x.dtype).at[:B, :].set(x)
    else:
        x_in = x

    grid = (Bp // tb,)

    # Resident (constant-index) specs for the tiny parameter tensors.
    resident = lambda arr: pl.BlockSpec(arr.shape, lambda i: (0, 0))

    out = pl.pallas_call(
        mlp_kernel,
        out_shape=jax.ShapeDtypeStruct((Bp, 1), jnp.float32),
        grid=grid,
        in_specs=[
            pl.BlockSpec((tb, F), lambda i: (i, 0)),   # x: batch-tiled, pipelined
            resident(w1), resident(b1),
            resident(w2), resident(b2),
            resident(w3), resident(b3),
        ],
        out_specs=pl.BlockSpec((tb, 1), lambda i: (i, 0)),
        compiler_params=pltpu.CompilerParams(
            dimension_semantics=("parallel",),         # megacore sharding on v7x
        ),
    )(x_in, w1, b1, w2, b2, w3, b3)

    return out[:B, :]


def init_params(key):
    """Deterministic init, PyTorch Linear shapes: weight (out, in), bias (out,)."""
    ks = jax.random.split(key, 6)

    def linear(kw, kb, fan_in, fan_out):
        bound = 1.0 / jnp.sqrt(fan_in)
        w = jax.random.uniform(kw, (fan_out, fan_in), jnp.float32, -bound, bound)
        b = jax.random.uniform(kb, (fan_out,), jnp.float32, -bound, bound)
        return w, b

    w1, b1 = linear(ks[0], ks[1], 17, 10)
    w2, b2 = linear(ks[2], ks[3], 10, 5)
    w3, b3 = linear(ks[4], ks[5], 5, 1)
    return {"w1": w1, "b1": b1, "w2": w2, "b2": b2, "w3": w3, "b3": b3}


def reference_forward(x, p):
    h1 = jnp.maximum(x @ p["w1"].T + p["b1"], 0.0)
    h2 = jnp.maximum(h1 @ p["w2"].T + p["b2"], 0.0)
    return h2 @ p["w3"].T + p["b3"]


if __name__ == "__main__":
    key = jax.random.PRNGKey(0)
    k_x, k_p, k_x2 = jax.random.split(key, 3)
    params = init_params(k_p)

    # Small batch (single tile).
    B = 8
    x = jax.random.normal(k_x, (B, 17), dtype=jnp.float32)
    out = jax.block_until_ready(network_forward(x, params))
    ref = reference_forward(x, params)
    assert out.shape == (B, 1)
    assert jnp.allclose(out, ref, atol=1e-5, rtol=1e-5), (out, ref)

    # Larger, non-multiple batch exercising the multi-tile grid + padding path.
    B2 = 520
    x2 = jax.random.normal(k_x2, (B2, 17), dtype=jnp.float32)
    out2 = jax.block_until_ready(network_forward(x2, params))
    ref2 = reference_forward(x2, params)
    assert out2.shape == (B2, 1)
    assert jnp.allclose(out2, ref2, atol=1e-5, rtol=1e-5)

    print("KERNEL_OK")
</pallas_src>

<mosaic_0001>
module attributes {stable_mosaic.version = 11 : i64} {
  func.func @mlp_kernel(%arg0: i32, %arg1: memref<8x17xf32, #tpu.memory_space<vmem>>, %arg2: memref<17x10xf32, #tpu.memory_space<vmem>>, %arg3: memref<1x10xf32, #tpu.memory_space<vmem>>, %arg4: memref<10x5xf32, #tpu.memory_space<vmem>>, %arg5: memref<1x5xf32, #tpu.memory_space<vmem>>, %arg6: memref<5x1xf32, #tpu.memory_space<vmem>>, %arg7: memref<1x1xf32, #tpu.memory_space<vmem>>, %arg8: memref<8x1xf32, #tpu.memory_space<vmem>>) attributes {dimension_semantics = [#tpu.dimension_semantics<parallel>], iteration_bounds = array<i64: 1>, scalar_prefetch = 0 : i64, scratch_operands = 0 : i64, tpu.core_type = #tpu.core_type<tc>, window_params = [{transform_indices = @transform_0, window_bounds = array<i64: 8, 17>}, {pipeline_mode = #tpu.pipeline_mode<synchronous>, transform_indices = @transform_1, window_bounds = array<i64: 17, 10>}, {pipeline_mode = #tpu.pipeline_mode<synchronous>, transform_indices = @transform_2, window_bounds = array<i64: 1, 10>}, {pipeline_mode = #tpu.pipeline_mode<synchronous>, transform_indices = @transform_3, window_bounds = array<i64: 10, 5>}, {pipeline_mode = #tpu.pipeline_mode<synchronous>, transform_indices = @transform_4, window_bounds = array<i64: 1, 5>}, {pipeline_mode = #tpu.pipeline_mode<synchronous>, transform_indices = @transform_5, window_bounds = array<i64: 5, 1>}, {pipeline_mode = #tpu.pipeline_mode<synchronous>, transform_indices = @transform_6, window_bounds = array<i64: 1, 1>}, {transform_indices = @transform_7, window_bounds = array<i64: 8, 1>}]} {
    %c0 = arith.constant 0 : index
    %c0_0 = arith.constant 0 : index
    %0 = vector.load %arg1[%c0, %c0_0] : memref<8x17xf32, #tpu.memory_space<vmem>>, vector<8x17xf32>
    %c0_1 = arith.constant 0 : index
    %c0_2 = arith.constant 0 : index
    %1 = vector.load %arg2[%c0_1, %c0_2] : memref<17x10xf32, #tpu.memory_space<vmem>>, vector<17x10xf32>
    %cst = arith.constant dense<0.000000e+00> : vector<8x10xf32>
    %2 = tpu.matmul %0, %1, %cst {dimension_numbers = #tpu.dot_dimension_numbers<[1], [0], [0], [1], [0, 0, 1, 1], [], []>} : vector<8x17xf32>, vector<17x10xf32>, vector<8x10xf32> -> vector<8x10xf32>
    %c0_3 = arith.constant 0 : index
    %c0_4 = arith.constant 0 : index
    %3 = vector.load %arg3[%c0_3, %c0_4] : memref<1x10xf32, #tpu.memory_space<vmem>>, vector<1x10xf32>
    %4 = vector.broadcast %3 : vector<1x10xf32> to vector<8x10xf32>
    %5 = arith.addf %2, %4 : vector<8x10xf32>
    %cst_5 = arith.constant 0.000000e+00 : f32
    %6 = vector.broadcast %cst_5 : f32 to vector<8x10xf32>
    %7 = arith.maximumf %5, %6 : vector<8x10xf32>
    %c0_6 = arith.constant 0 : index
    %c0_7 = arith.constant 0 : index
    %8 = vector.load %arg4[%c0_6, %c0_7] : memref<10x5xf32, #tpu.memory_space<vmem>>, vector<10x5xf32>
    %cst_8 = arith.constant dense<0.000000e+00> : vector<8x5xf32>
    %9 = tpu.matmul %7, %8, %cst_8 {dimension_numbers = #tpu.dot_dimension_numbers<[1], [0], [0], [1], [0, 0, 1, 1], [], []>} : vector<8x10xf32>, vector<10x5xf32>, vector<8x5xf32> -> vector<8x5xf32>
    %c0_9 = arith.constant 0 : index
    %c0_10 = arith.constant 0 : index
    %10 = vector.load %arg5[%c0_9, %c0_10] : memref<1x5xf32, #tpu.memory_space<vmem>>, vector<1x5xf32>
    %11 = vector.broadcast %10 : vector<1x5xf32> to vector<8x5xf32>
    %12 = arith.addf %9, %11 : vector<8x5xf32>
    %cst_11 = arith.constant 0.000000e+00 : f32
    %13 = vector.broadcast %cst_11 : f32 to vector<8x5xf32>
    %14 = arith.maximumf %12, %13 : vector<8x5xf32>
    %c0_12 = arith.constant 0 : index
    %c0_13 = arith.constant 0 : index
    %15 = vector.load %arg6[%c0_12, %c0_13] : memref<5x1xf32, #tpu.memory_space<vmem>>, vector<5x1xf32>
    %cst_14 = arith.constant dense<0.000000e+00> : vector<8x1xf32>
    %16 = tpu.matmul %14, %15, %cst_14 {dimension_numbers = #tpu.dot_dimension_numbers<[1], [0], [0], [1], [0, 0, 1, 1], [], []>} : vector<8x5xf32>, vector<5x1xf32>, vector<8x1xf32> -> vector<8x1xf32>
    %c0_15 = arith.constant 0 : index
    %c0_16 = arith.constant 0 : index
    %17 = vector.load %arg7[%c0_15, %c0_16] : memref<1x1xf32, #tpu.memory_space<vmem>>, vector<1x1xf32>
    %18 = vector.broadcast %17 : vector<1x1xf32> to vector<8x1xf32>
    %19 = arith.addf %16, %18 : vector<8x1xf32>
    %c0_17 = arith.constant 0 : index
    %c0_18 = arith.constant 0 : index
    %20 = vector.load %arg8[%c0_17, %c0_18] : memref<8x1xf32, #tpu.memory_space<vmem>>, vector<8x1xf32>
    tpu.vector_store %arg8[%c0_17, %c0_18], %19 {strides = array<i32>} : memref<8x1xf32, #tpu.memory_space<vmem>>, vector<8x1xf32>,
    return
  }
  func.func @transform_0(%arg0: i32) -> (i32, i32) {
    %c0_i32 = arith.constant 0 : i32
    %c0_i32_0 = arith.constant 0 : i32
    return %arg0, %c0_i32 : i32, i32
  }
  func.func @transform_1(%arg0: i32) -> (i32, i32) {
    %c0_i32 = arith.constant 0 : i32
    %c0_i32_0 = arith.constant 0 : i32
    %c0_i32_1 = arith.constant 0 : i32
    return %c0_i32, %c0_i32_0 : i32, i32
  }
  func.func @transform_2(%arg0: i32) -> (i32, i32) {
    %c0_i32 = arith.constant 0 : i32
    %c0_i32_0 = arith.constant 0 : i32
    %c0_i32_1 = arith.constant 0 : i32
    return %c0_i32, %c0_i32_0 : i32, i32
  }
  func.func @transform_3(%arg0: i32) -> (i32, i32) {
    %c0_i32 = arith.constant 0 : i32
    %c0_i32_0 = arith.constant 0 : i32
    %c0_i32_1 = arith.constant 0 : i32
    return %c0_i32, %c0_i32_0 : i32, i32
  }
  func.func @transform_4(%arg0: i32) -> (i32, i32) {
    %c0_i32 = arith.constant 0 : i32
    %c0_i32_0 = arith.constant 0 : i32
    %c0_i32_1 = arith.constant 0 : i32
    return %c0_i32, %c0_i32_0 : i32, i32
  }
  func.func @transform_5(%arg0: i32) -> (i32, i32) {
    %c0_i32 = arith.constant 0 : i32
    %c0_i32_0 = arith.constant 0 : i32
    %c0_i32_1 = arith.constant 0 : i32
    return %c0_i32, %c0_i32_0 : i32, i32
  }
  func.func @transform_6(%arg0: i32) -> (i32, i32) {
    %c0_i32 = arith.constant 0 : i32
    %c0_i32_0 = arith.constant 0 : i32
    %c0_i32_1 = arith.constant 0 : i32
    return %c0_i32, %c0_i32_0 : i32, i32
  }
  func.func @transform_7(%arg0: i32) -> (i32, i32) {
    %c0_i32 = arith.constant 0 : i32
    %c0_i32_0 = arith.constant 0 : i32
    return %arg0, %c0_i32 : i32, i32
  }
}

</mosaic_0001>

<bundles_post_ra>
// kernel: tpu_custom_call.1
= control target key start
LH: loop header
LB: loop body
LE: loop exit
PB: predicated region body
PF: predicated region fallthrough
CT: control target
= control target key end

     0   :  { %vm43_vm0 = vcmask 1040384   ;;  %v339_v0 = vmov 0.0   ;;  %vm340_vm1 = vmmov 0   ;;  %vm39_vm2 = vcmask 138240   ;;  %s417_s1 = inlined_call_operand.vmem [shape: f32[17,10], index: 1, kind: input, shape index: {}]   ;;  %s418_s0 = inlined_call_operand.vmem [shape: f32[8,17], index: 0, kind: input, shape index: {}]   ;;  %s419_s3 = inlined_call_operand.vmem [shape: f32[10,5], index: 3, kind: input, shape index: {}]   ;;  %s420_s2 = inlined_call_operand.vmem [shape: f32[1,10], index: 2, kind: input, shape index: {}]   ;;  %s421_s5 = inlined_call_operand.vmem [shape: f32[5,1], index: 5, kind: input, shape index: {}]   ;;  %s422_s6 = inlined_call_operand.<no memory space> [shape: f32[1,1], index: 6, kind: input, shape index: {}]   ;;  %s423_s4 = inlined_call_operand.vmem [shape: f32[1,5], index: 4, kind: input, shape index: {}]   ;;  %s424_s7 = inlined_call_operand.vmem [shape: f32[8,1], index: 7, kind: output, shape index: {}]  }
   0x1   :  { %316 = vmatprep.subr.mxu0 %v339_v0  ;;  %v31_v1 = vld [vmem:[%s417_s1 + $0x10] sm:$0x1]  ;;  %v30_v2 = vld [vmem:[%s417_s1 + $0x8] sm:$0xff]  ;;  %322 = vmatprep.mubr.msk.f32.mxu0 %vm340_vm1, %v339_v0  ;;  %v29_v3 = vld [vmem:[%s417_s1] sm:$0xff]  ;;  %vm131_vm3 = vcmask 1041408   ;;  %vm127_vm4 = vcmask 80896   ;;  %v12_v13 = vstv %s422_s6 }
   0x2   :  { %317 = vmatpush3.msk.msra.mxu0 %vm43_vm0, %v31_v1  ;;  %325 = vmatprep.subr.mxu1 %v339_v0  ;;  %v28_v4 = vld [vmem:[%s418_s0] sm:$0xff]  ;;  %v119_v5 = vld [vmem:[%s419_s3 + $0x8] sm:$0x3]  ;;  %vm218_vm5 = vcmask 1044480   ;;  %13 = vst [vmem:[#allocation2] sm:$0x1] %v12_v13 }
   0x3   :  { %318 = vmatprep.subr.mxu0 %v339_v0  ;;  %329 = vmatprep.mubr.msk.f32.mxu1 %vm340_vm1, %v339_v0  ;;  %v118_v6 = vld [vmem:[%s419_s3] sm:$0xff]  ;;  %vm214_vm6 = vcmask 39936   ;;  %vm292_vm7 = vcmask 7168  }
   0x4   :  { %319 = vmatpush3.msra.mxu0 %v30_v2  ;;  %326 = vmatpush3.msk.msra.mxu1 %vm131_vm3, %v119_v5  ;;  %v298_v7 = vld [vmem:[%s420_s2] ss:$0 sm:$0xff] }
   0x5   :  { %320 = vmatprep.subr.mxu0 %v339_v0  ;;  %327 = vmatprep.subr.mxu1 %v339_v0  ;;  %v206_v12 = vld [vmem:[%s421_s5] sm:$0x1f] }
   0x6   :  { %321 = vmatpush3.msra.mxu0 %v29_v3  ;;  %328 = vmatpush3.msra.mxu1 %v118_v6  ;;  %v301_v14 = vld [vmem:[%s423_s4] ss:$0 sm:$0xff] }
   0x7   :  { %323 = vmatmul.mubr.msk.f32.vlgmr.msra.gmra.mxu0 %vm39_vm2, %v28_v4  ;;  %332 = vmatprep.subr.mxu1 %v339_v0 }
   0x9   :  { %v304_v19 = vld [vmem:[#allocation2] ss:$0 sm:$0xff] }
  0xc7   :  { %v113_v8 = vpop.f32.mrf.mxu0 }
  0xc8   :  { %v114_v9 = vadd.f32 %v298_v7, %v113_v8 }
  0xc9   :  { %v324_v10 = vpop.f32.mrf.mxu0 }
  0xca   :  { %v117_v11 = vmax.f32 %v114_v9, 0.0 }
  0xcc   :  { %330 = vmatmul.mubr.msk.f32.vlgmr.msra.gmra.mxu1 %vm127_vm4, %v117_v11 }
  0xcd   :  { %334 = vmatprep.mubr.msk.f32.mxu1 %vm340_vm1, %v339_v0  ;;  %333 = vmatpush3.msk.msra.mxu1 %vm218_vm5, %v206_v12 }
 0x18c   :  { %v201_v15 = vpop.f32.mrf.mxu1 }
 0x18d   :  { %v202_v16 = vadd.f32 %v301_v14, %v201_v15 }
 0x18e   :  { %v331_v17 = vpop.f32.mrf.mxu1 }
 0x18f   :  { %v205_v18 = vmax.f32 %v202_v16, 0.0 }
 0x191   :  { %335 = vmatmul.mubr.msk.f32.vlgmr.msra.gmra.mxu1 %vm214_vm6, %v205_v18 }
 0x251   :  { %v288_v20 = vpop.f32.mrf.mxu1 }
 0x252   :  { %v289_v21 = vadd.f32 %v304_v19, %v288_v20 }
 0x253   :  { %v336_v22 = vpop.f32.mrf.mxu1 }
 0x254   :  { %293 = vst.msk [vmem:[%s424_s7] sm:$0xff] %vm292_vm7, %v289_v21 }

</bundles_post_ra>
